<compile_context>
chip_gen: v5e
topology: v5e:2x2
jax: 0.10.0
libtpu: 0.0.40
codegen_flags: <defaults>
</compile_context>

<pallas_src>
import functools

import jax
import jax.numpy as jnp
from jax.experimental import pallas as pl
from jax.experimental.pallas import tpu as pltpu


STATE_DIM = 3
ACTION_DIM = 3
HIDDEN = 32
BATCH = 200          # small demo batch (padded to a lane multiple in the wrapper)

_LANE = 128          # lane width: batch tile must be a multiple of this
_SPAD = 8            # state/output rows padded to one sublane group


def _round_up(x, m):
    return ((x + m - 1) // m) * m


def _make_kernel(in_dim, hidden, s_pad):
    """Static layout constants baked into the trace."""
    c_w1 = 0
    c_b1 = in_dim
    c_w2 = in_dim + 1
    c_b2 = in_dim + 1 + hidden
    c_w3 = in_dim + 2 + hidden
    c_b3 = in_dim + 2 + 2 * hidden

    def kernel(x_ref, p_ref, out_ref):
        # Batch-on-lanes: every tensor below is (rows, tile_b), lane-dense.
        xin = x_ref[0:in_dim, :].astype(jnp.float32)               # concat(state, action)^T
        tgt = x_ref[in_dim:in_dim + s_pad, :].astype(jnp.float32)  # target^T, zero-padded rows

        # Static slices of the resident parameter slab (no runtime cost).
        w1t = p_ref[:, c_w1:c_w1 + in_dim]          # (H, in_dim)
        b1c = p_ref[:, c_b1:c_b1 + 1]               # (H, 1)
        w2t = p_ref[:, c_w2:c_w2 + hidden]          # (H, H)
        b2c = p_ref[:, c_b2:c_b2 + 1]               # (H, 1)
        w3t = p_ref[0:s_pad, c_w3:c_w3 + hidden]    # (s_pad, H), rows >= STATE_DIM are zero
        b3c = p_ref[0:s_pad, c_b3:c_b3 + 1]         # (s_pad, 1), rows >= STATE_DIM are zero

        # MLP dynamics model forward, transposed; f32 MXU accumulation.
        h1 = jnp.maximum(
            jnp.dot(w1t, xin, preferred_element_type=jnp.float32) + b1c, 0.0)
        h2 = jnp.maximum(
            jnp.dot(w2t, h1, preferred_element_type=jnp.float32) + b2c, 0.0)
        pred = jnp.dot(w3t, h2, preferred_element_type=jnp.float32) + b3c   # (s_pad, tile_b)

        # Squared error; padded state rows are exactly zero (zero weights/bias/target).
        diff = pred - tgt
        sse = jnp.sum(diff * diff, axis=0, keepdims=True)          # per-sample SSE (1, tile_b)
        out_ref[0, :, :] = sse

    return kernel


def single_step_loss(params, state, action, target_state, *,
                     max_tile_b=4096, input_dtype=jnp.float32):
    """Pallas implementation of SingleStepLoss.forward(model, state, action, target).

    input_dtype=jnp.bfloat16 halves the batch-scaled HBM traffic on v6e/v7x at
    large batch, at the cost of bit-exactness vs the f32 reference.
    """
    w1, b1, w2, b2, w3, b3 = params
    batch, state_dim = state.shape
    action_dim = action.shape[1]
    hidden = w1.shape[1]
    in_dim = state_dim + action_dim
    s_pad = _round_up(state_dim, _SPAD)

    # Lane-aligned batch tiling; the common (small-batch) case is grid=(1,).
    tile_b = min(_round_up(max_tile_b, _LANE), _round_up(batch, _LANE))
    num_tiles = int(pl.cdiv(batch, tile_b))
    padded_b = num_tiles * tile_b

    # Data slab: rows = [state^T; action^T; target^T zero-padded to s_pad rows],
    # batch on the lane axis, zero-padded columns past `batch`.
    x_slab = jnp.concatenate(
        [state.T, action.T,
         jnp.pad(target_state.T, ((0, s_pad - state_dim), (0, 0)))], axis=0)
    x_slab = jnp.pad(x_slab, ((0, 0), (0, padded_b - batch))).astype(input_dtype)

    # Single resident parameter slab: [W1^T | b1 | W2^T | b2 | W3^T(pad) | b3(pad)].
    pad_rows = lambda m: jnp.pad(m, ((0, hidden - m.shape[0]), (0, 0)))
    p_slab = jnp.concatenate(
        [w1.T, b1.T, w2.T, b2.T, pad_rows(w3.T), pad_rows(b3.T)],
        axis=1).astype(jnp.float32)

    itemsize = jnp.dtype(input_dtype).itemsize
    flops = 2 * padded_b * (in_dim * hidden + hidden * hidden + hidden * s_pad)
    bytes_accessed = (int(x_slab.size) * itemsize + int(p_slab.size) * 4
                      + num_tiles * tile_b * 4)

    partials = pl.pallas_call(
        _make_kernel(in_dim, hidden, s_pad),
        out_shape=jax.ShapeDtypeStruct((num_tiles, 1, tile_b), jnp.float32),
        grid=(num_tiles,),
        in_specs=[
            # (14, tile_b) data block: full sublane extent, lane-tiled over batch.
            pl.BlockSpec((in_dim + s_pad, tile_b), lambda i: (0, i)),
            # Parameter slab stays VMEM-resident (constant index_map => one DMA).
            pl.BlockSpec(p_slab.shape, lambda i: (0, 0)),
        ],
        out_specs=pl.BlockSpec((1, 1, tile_b), lambda i: (i, 0, 0)),
        compiler_params=pltpu.CompilerParams(dimension_semantics=("parallel",)),
        cost_estimate=pl.CostEstimate(flops=int(flops), transcendentals=0,
                                      bytes_accessed=int(bytes_accessed)),
    )(x_slab, p_slab)

    # Tiny JAX epilogue: drop padded batch columns, finish nn.MSELoss mean.
    per_sample_sse = partials.reshape(num_tiles * tile_b)[:batch]
    return jnp.sum(per_sample_sse) * (1.0 / float(batch * state_dim))


def init_params(key):
    """Deterministic synthetic weights for the MLP dynamics model."""
    k1, k2, k3, k4, k5, k6 = jax.random.split(key, 6)
    in_dim = STATE_DIM + ACTION_DIM
    w1 = jax.random.normal(k1, (in_dim, HIDDEN), jnp.float32) * 0.1
    b1 = jax.random.normal(k2, (1, HIDDEN), jnp.float32) * 0.1
    w2 = jax.random.normal(k3, (HIDDEN, HIDDEN), jnp.float32) * 0.1
    b2 = jax.random.normal(k4, (1, HIDDEN), jnp.float32) * 0.1
    w3 = jax.random.normal(k5, (HIDDEN, STATE_DIM), jnp.float32) * 0.1
    b3 = jax.random.normal(k6, (1, STATE_DIM), jnp.float32) * 0.1
    return (w1, b1, w2, b2, w3, b3)


def _reference_loss(params, state, action, target_state):
    """Pure-JAX reference (matches the PyTorch module semantics)."""
    w1, b1, w2, b2, w3, b3 = params
    x = jnp.concatenate([state, action], axis=-1)
    h1 = jnp.maximum(x @ w1 + b1, 0.0)
    h2 = jnp.maximum(h1 @ w2 + b2, 0.0)
    pred = h2 @ w3 + b3
    return jnp.mean((pred - target_state) ** 2)


if __name__ == "__main__":
    key = jax.random.PRNGKey(0)
    kp, ks, ka, kt = jax.random.split(key, 4)

    params = init_params(kp)
    state = jax.random.normal(ks, (BATCH, STATE_DIM), jnp.float32)
    action = jax.random.normal(ka, (BATCH, ACTION_DIM), jnp.float32)
    target_state = jax.random.normal(kt, (BATCH, STATE_DIM), jnp.float32)

    # max_tile_b=128 at BATCH=200 exercises the multi-tile ("parallel") grid and
    # the padded-column handling while keeping shapes small.
    loss_fn = jax.jit(functools.partial(single_step_loss, max_tile_b=128))
    loss = loss_fn(params, state, action, target_state)
    jax.block_until_ready(loss)

    ref = _reference_loss(params, state, action, target_state)
    assert jnp.allclose(loss, ref, rtol=1e-5, atol=1e-5), (loss, ref)

    print("KERNEL_OK")
</pallas_src>

<mosaic_0001>
module attributes {stable_mosaic.version = 11 : i64} {
  func.func @kernel(%arg0: i32, %arg1: memref<14x128xf32, #tpu.memory_space<vmem>>, %arg2: memref<32x73xf32, #tpu.memory_space<vmem>>, %arg3: memref<1x1x128xf32, #tpu.memory_space<vmem>>) attributes {dimension_semantics = [#tpu.dimension_semantics<parallel>], iteration_bounds = array<i64: 2>, scalar_prefetch = 0 : i64, scratch_operands = 0 : i64, tpu.core_type = #tpu.core_type<tc>, window_params = [{transform_indices = @transform_0, window_bounds = array<i64: 14, 128>}, {pipeline_mode = #tpu.pipeline_mode<synchronous>, transform_indices = @transform_1, window_bounds = array<i64: 32, 73>}, {transform_indices = @transform_2, window_bounds = array<i64: 1, 1, 128>}]} {
    %c0 = arith.constant 0 : index
    %c0_0 = arith.constant 0 : index
    %0 = vector.load %arg1[%c0, %c0_0] : memref<14x128xf32, #tpu.memory_space<vmem>>, vector<6x128xf32>
    %c6 = arith.constant 6 : index
    %c0_1 = arith.constant 0 : index
    %1 = vector.load %arg1[%c6, %c0_1] : memref<14x128xf32, #tpu.memory_space<vmem>>, vector<8x128xf32>
    %c0_2 = arith.constant 0 : index
    %c0_3 = arith.constant 0 : index
    %2 = vector.load %arg2[%c0_2, %c0_3] : memref<32x73xf32, #tpu.memory_space<vmem>>, vector<32x6xf32>
    %c0_4 = arith.constant 0 : index
    %c6_5 = arith.constant 6 : index
    %3 = vector.load %arg2[%c0_4, %c6_5] : memref<32x73xf32, #tpu.memory_space<vmem>>, vector<32x1xf32>
    %c0_6 = arith.constant 0 : index
    %c7 = arith.constant 7 : index
    %4 = vector.load %arg2[%c0_6, %c7] : memref<32x73xf32, #tpu.memory_space<vmem>>, vector<32x32xf32>
    %c0_7 = arith.constant 0 : index
    %c39 = arith.constant 39 : index
    %5 = vector.load %arg2[%c0_7, %c39] : memref<32x73xf32, #tpu.memory_space<vmem>>, vector<32x1xf32>
    %c0_8 = arith.constant 0 : index
    %c40 = arith.constant 40 : index
    %6 = vector.load %arg2[%c0_8, %c40] : memref<32x73xf32, #tpu.memory_space<vmem>>, vector<8x32xf32>
    %c0_9 = arith.constant 0 : index
    %c72 = arith.constant 72 : index
    %7 = vector.load %arg2[%c0_9, %c72] : memref<32x73xf32, #tpu.memory_space<vmem>>, vector<8x1xf32>
    %cst = arith.constant dense<0.000000e+00> : vector<32x128xf32>
    %8 = tpu.matmul %2, %0, %cst {dimension_numbers = #tpu.dot_dimension_numbers<[1], [0], [0], [1], [0, 0, 1, 1], [], []>} : vector<32x6xf32>, vector<6x128xf32>, vector<32x128xf32> -> vector<32x128xf32>
    %9 = vector.broadcast %3 : vector<32x1xf32> to vector<32x128xf32>
    %10 = arith.addf %8, %9 : vector<32x128xf32>
    %cst_10 = arith.constant 0.000000e+00 : f32
    %11 = vector.broadcast %cst_10 : f32 to vector<32x128xf32>
    %12 = arith.maximumf %10, %11 : vector<32x128xf32>
    %cst_11 = arith.constant dense<0.000000e+00> : vector<32x128xf32>
    %13 = tpu.matmul %4, %12, %cst_11 {dimension_numbers = #tpu.dot_dimension_numbers<[1], [0], [0], [1], [0, 0, 1, 1], [], []>} : vector<32x32xf32>, vector<32x128xf32>, vector<32x128xf32> -> vector<32x128xf32>
    %14 = vector.broadcast %5 : vector<32x1xf32> to vector<32x128xf32>
    %15 = arith.addf %13, %14 : vector<32x128xf32>
    %cst_12 = arith.constant 0.000000e+00 : f32
    %16 = vector.broadcast %cst_12 : f32 to vector<32x128xf32>
    %17 = arith.maximumf %15, %16 : vector<32x128xf32>
    %cst_13 = arith.constant dense<0.000000e+00> : vector<8x128xf32>
    %18 = tpu.matmul %6, %17, %cst_13 {dimension_numbers = #tpu.dot_dimension_numbers<[1], [0], [0], [1], [0, 0, 1, 1], [], []>} : vector<8x32xf32>, vector<32x128xf32>, vector<8x128xf32> -> vector<8x128xf32>
    %19 = vector.broadcast %7 : vector<8x1xf32> to vector<8x128xf32>
    %20 = arith.addf %18, %19 : vector<8x128xf32>
    %21 = arith.subf %20, %1 : vector<8x128xf32>
    %22 = arith.mulf %21, %21 : vector<8x128xf32>
    %cst_14 = arith.constant dense<0.000000e+00> : vector<128xf32>
    %23 = vector.multi_reduction <add>, %22, %cst_14 [0] : vector<8x128xf32> to vector<128xf32>
    %24 = vector.shape_cast %23 : vector<128xf32> to vector<1x128xf32>
    %c0_15 = arith.constant 0 : index
    %c0_16 = arith.constant 0 : index
    %c0_17 = arith.constant 0 : index
    %25 = vector.load %arg3[%c0_15, %c0_16, %c0_17] : memref<1x1x128xf32, #tpu.memory_space<vmem>>, vector<1x1x128xf32>
    %26 = vector.shape_cast %25 : vector<1x1x128xf32> to vector<1x128xf32>
    %27 = vector.shape_cast %24 : vector<1x128xf32> to vector<1x1x128xf32>
    tpu.vector_store %arg3[%c0_15, %c0_16, %c0_17], %27 {strides = array<i32>} : memref<1x1x128xf32, #tpu.memory_space<vmem>>, vector<1x1x128xf32>,
    return
  }
  func.func @transform_0(%arg0: i32) -> (i32, i32) {
    %c0_i32 = arith.constant 0 : i32
    %c0_i32_0 = arith.constant 0 : i32
    return %c0_i32, %arg0 : i32, i32
  }
  func.func @transform_1(%arg0: i32) -> (i32, i32) {
    %c0_i32 = arith.constant 0 : i32
    %c0_i32_0 = arith.constant 0 : i32
    %c0_i32_1 = arith.constant 0 : i32
    return %c0_i32, %c0_i32_0 : i32, i32
  }
  func.func @transform_2(%arg0: i32) -> (i32, i32, i32) {
    %c0_i32 = arith.constant 0 : i32
    %c0_i32_0 = arith.constant 0 : i32
    %c0_i32_1 = arith.constant 0 : i32
    return %arg0, %c0_i32, %c0_i32_0 : i32, i32, i32
  }
}

</mosaic_0001>

<bundles_post_ra>
// kernel: single_step_loss.1
= control target key start
LH: loop header
LB: loop body
LE: loop exit
PB: predicated region body
PF: predicated region fallthrough
CT: control target
= control target key end

     0   :  { %s512_s9 = smov 0   ;;  %s514_s10 = smov 0   ;;  %s604_s0 = inlined_call_operand.vmem [shape: f32[14,256], index: 0, kind: input, shape index: {}]   ;;  %s605_s1 = inlined_call_operand.vmem [shape: f32[32,73], index: 1, kind: input, shape index: {}]   ;;  %s606_s2 = inlined_call_operand.vmem [shape: f32[2,1,128], index: 2, kind: output, shape index: {}]  }
   0x1   :  { %s516_s11 = smov 0  }
   0x2 LB: > { %s407_s12 = sadd.s32 4294967295, %s490_s11   ;;  %s529_s13 = sadd.s32 1, %s490_s11   ;;  %s490_s11 = sphi %s516_s11, %s609_s11   ;;  %s486_s10 = sphi %s514_s10, %s608_s10   ;;  %s482_s9 = sphi %s512_s9, %s607_s9  }
   0x3   : > { %s16_s14 = ssub.s32 %s490_s11, %s529_s13  ;;  %s19_s15 = sadd.s32 1, %s486_s10 }
   0x4   : > { %p17_p0 = scmp.eq.s32.totalorder %s16_s14, 0  ;;  %p26_p1 = scmp.ne.s32.totalorder %s486_s10, %s482_s9 }
   0x5   : > { %p27_p2 = scmp.eq.s32.totalorder %s490_s11, 0  ;;  %p410_p4 = scmp.ge.s32.totalorder %s490_s11, 2 }
   0x6   : > { %s538_s16 = scalar_select %p17_p0, %s486_s10, %s19_s15  }
   0x7   : > { %p28_p3 = por %p27_p2, %p26_p1  ;;  %102 = sbr.rel (%p410_p4) target bundleno = 18 (0x12), region = 20 }
   0xc   : > { %105 = sbr.rel (!%p28_p3) target bundleno = 18 (0x12), region = 24  ;;  %s107_s17 = sand.u32 (%p28_p3), 1, %s486_s10  }
   0xd   : > { %s412_s18 = sshll.u32 (%p28_p3), %s490_s11, 3  ;;  %s411_s19 = sshll.u32 (%p28_p3), %s107_s17, 4 }
   0xe   : > { %s111_s22 = scalar_lea.vmem (%p28_p3), %s604_s0, %s412_s18  ;;  %s109_s23 = scalar_lea.vmem (%p28_p3), [#allocation2], %s411_s19 }
   0xf   : > { %v142_v0 = vld [vmem:[%s111_s22] sm:$0xff] (%p28_p3)  ;;  %v144_v1 = vld [vmem:[%s111_s22 + $0x10] sm:$0xff] (%p28_p3) }
  0x10   : > { %143 = vst [vmem:[%s109_s23] sm:$0xff] (%p28_p3), %v142_v0 }
  0x11   : > { %145 = vst [vmem:[%s109_s23 + $0x8] sm:$0xff] %v144_v1 }
  0x12 PF: > { %p413_p5 = scmp.ge.s32.totalorder %s490_s11, 1  ;;  %p150_p6 = scmp.lt.s32.totalorder %s490_s11, 3 }
  0x14   : > { %p151_p7 = pnand %p413_p5, %p150_p6 }
  0x15   : > { %s157_s24 = sand.u32 (!%p151_p7), 1, %s482_s9   ;;  %s493_s7 = smov (!%p151_p7), 121  }
  0x16   : > { %154 = sbr.rel (%p151_p7) target bundleno = 484 (0x1e4), region = 62  ;;  %s549_s25 = sshll.u32 (!%p151_p7), %s157_s24, 4 }
  0x17   : > { %s159_s6 = scalar_lea.vmem (!%p151_p7), [#allocation2], %s549_s25  ;;  %s495_s8 = smov (!%p151_p7), 88  }
  0x18   : > { %p176_p8 = scmp.lt.s32.totalorder (!%p151_p7), %s407_s12, 1 }
  0x1b   : > { %vm214_vm0 = vcmask 1045504   ;;  %v492_v2 = vmov 6   ;;  %v184_v3 = vld [vmem:[%s605_s1 + $0x18] sm:$0xff]  ;;  %v182_v4 = vld [vmem:[%s605_s1 + $0x8] sm:$0xff]  ;;  %v560_v5 = vld [vmem:[%s605_s1] sm:$0xff]  ;;  %vm205_vm1 = vcmask 48128  }
  0x1c   : > { %462 = vset.pattern.permute.xlu1 %v492_v2  ;;  %461 = vset.pattern.permute.xlu0 %v492_v2  ;;  %v183_v6 = vld [vmem:[%s605_s1 + $0x10] sm:$0xff]  ;;  %v494_v9 = vmov 39   ;;  %vm275_vm2 = vcmask 261120   ;;  %v496_v29 = vmov 72   ;;  %s611_s12 = smov (!%p176_p8, %s407_s12), 1 }
  0x1d   : > { %192 = vperm.xlu1 %462, %v182_v4   ;;  %202 = vperm.xlu0 %461, %v184_v3   ;;  %v179_v7 = vld [vmem:[%s159_s6] sm:$0x3f]  ;;  %v180_v48 = vld [vmem:[%s159_s6 + $0x6] sm:$0xff]  ;;  %s178_s15 = scalar_lea.vmem %s606_s2, %s611_s12 }
  0x1e   : > { %271 = vrot.lane.b32.xlu2 %v183_v6, %s493_s7  ;;  %415 = vmatpush.msk.msra.mxu0 %vm214_vm0, %v179_v7 }
  0x1f   : > { %427 = vmatpush.msk.msra.mxu2 %vm214_vm0, %v179_v7  ;;  %416 = vmatmul.msk.f32.vlgmr.msra.gmra.mxu0 %vm205_vm1, %v560_v5 }
  0x20   : > { %419 = vmatmul.msk.f32.vlgmr.msra.gmra.mxu2 %vm205_vm1, %v184_v3  ;;  %463 = vset.pattern.permute.xlu2 %v494_v9 }
  0x25   : > { %187 = vperm.xlu1 %462, %v560_v5   ;;  %197 = vperm.xlu0 %461, %v183_v6  }
  0x26   : > { %273 = vrot.lane.b32.xlu2 %v184_v3, %s493_s7 }
  0x27   : > { %417 = vmatmul.msk.f32.gmra.mxu0 %vm205_vm1, %v182_v4 }
  0x2d   : > { %267 = vrot.lane.b32.xlu0 %v560_v5, %s493_s7  ;;  %269 = vrot.lane.b32.xlu1 %v182_v4, %s493_s7 }
  0x2e   : > { %464 = vset.pattern.permute.xlu0 %v494_v9  ;;  %465 = vset.pattern.permute.xlu1 %v494_v9 }
  0x2f   : > { %418 = vmatmul.msk.f32.gmra.mxu0 %vm205_vm1, %v183_v6  ;;  %264 = vperm.xlu2 %463, %v184_v3  }
  0x35   : > { %260 = vperm.xlu0 %464, %v183_v6   ;;  %256 = vperm.xlu1 %465, %v182_v4  }
  0x37   : > { %252 = vperm.xlu2 %463, %v560_v5  }
  0x3d   : > { %321 = vrot.lane.b32.xlu1 %v560_v5, %s495_s8  ;;  %467 = vset.pattern.permute.xlu0 %v496_v29 }
  0x3f   : > { %466 = vset.pattern.permute.xlu2 %v496_v29 }
  0x40   : > { %318 = vperm.xlu2 %466, %v560_v5  }
  0x78   : > { %v272_v24 = vpop.permute.xlu2 %271 }
  0x80   : > { %v274_v27 = vpop.permute.xlu2 %273 }
  0x89   : > { %v265_v31 = vpop.permute.xlu2 %264 }
  0x8f   : > { %v203_v10 = vpop.permute.xlu0 %202  ;;  %v193_v11 = vpop.permute.xlu1 %192 }
  0x91   : > { %v253_v40 = vpop.permute.xlu2 %252 }
  0x97   : > { %v198_v16 = vpop.permute.xlu0 %197  ;;  %v188_v17 = vpop.permute.xlu1 %187 }
  0x9a   : > { %v319_v47 = vpop.permute.xlu2 %318 }
  0x9c   : > { %v235_v8 = vpop.f32.mrf.mxu0 }
  0x9d   : > { %v236_v21 = vadd.f32 %v235_v8, %v188_v17 }
  0x9f   : > { %v247_v25 = vmax.f32 %v236_v21, 0.0  ;;  %v268_v26 = vpop.permute.xlu0 %267  ;;  %v270_v28 = vpop.permute.xlu1 %269 }
  0xa3   : > { %v244_v12 = vpop.f32.mrf.mxu2 }
  0xa4   : > { %v245_v13 = vadd.f32 %v244_v12, %v203_v10  ;;  %v238_v14 = vpop.f32.mrf.mxu0 }
  0xa5   : > { %v239_v19 = vadd.f32 %v238_v14, %v193_v11 }
  0xa6   : > { %v250_v15 = vmax.f32 %v245_v13, 0.0 }
  0xa7   : > { %v248_v23 = vmax.f32 %v239_v19, 0.0  ;;  %v261_v33 = vpop.permute.xlu0 %260  ;;  %v257_v34 = vpop.permute.xlu1 %256 }
  0xa8   : > { %296 = vmatpush.msra.mxu1 %v250_v15  ;;  %428 = vmatpush.msra.mxu3 %v250_v15 }
  0xac   : > { %v241_v18 = vpop.f32.mrf.mxu0 }
  0xad   : > { %v242_v20 = vadd.f32 %v241_v18, %v198_v16 }
  0xaf   : > { %v249_v22 = vmax.f32 %v242_v20, 0.0  ;;  %v322_v46 = vpop.permute.xlu1 %321 }
  0xb1   : > { %297 = vmatpush.msra.mxu1 %v249_v22  ;;  %429 = vmatpush.msra.mxu3 %v249_v22 }
  0xb3   : > { %298 = vmatpush.msra.mxu1 %v248_v23  ;;  %430 = vmatpush.msra.mxu3 %v248_v23 }
  0xb5   : > { %299 = vmatpush.msra.mxu1 %v247_v25  ;;  %431 = vmatpush.msra.mxu3 %v247_v25 }
  0xb6   : > { %422 = vmatmul.msk.f32.vlgmr.msra.gmra.mxu3 %vm275_vm2, %v272_v24  ;;  %420 = vmatmul.msk.f32.vlgmr.msra.gmra.mxu1 %vm275_vm2, %v268_v26 }
  0xbe   : > { %423 = vmatmul.msk.f32.gmra.mxu3 %vm275_vm2, %v274_v27  ;;  %421 = vmatmul.msk.f32.gmra.mxu1 %vm275_vm2, %v270_v28 }
 0x133   : > { %v301_v30 = vpop.f32.mrf.mxu1 }
 0x134   : > { %v302_v43 = vadd.f32 %v301_v30, %v253_v40 }
 0x136   : > { %v313_v45 = vmax.f32 %v302_v43, 0.0 }
 0x139   : > { %v307_v32 = vpop.f32.mrf.mxu3 }
 0x13a   : > { %v308_v37 = vadd.f32 %v307_v32, %v261_v33 }
 0x13b   : > { %v304_v35 = vpop.f32.mrf.mxu1 }
 0x13c   : > { %v305_v39 = vadd.f32 %v304_v35, %v257_v34  ;;  %v315_v42 = vmax.f32 %v308_v37, 0.0 }
 0x13e   : > { %v314_v44 = vmax.f32 %v305_v39, 0.0 }
 0x141   : > { %v310_v36 = vpop.f32.mrf.mxu3 }
 0x142   : > { %v311_v38 = vadd.f32 %v310_v36, %v265_v31 }
 0x144   : > { %v316_v41 = vmax.f32 %v311_v38, 0.0 }
 0x146   : > { %337 = vmatpush.msrb.mxu2 %v316_v41 }
 0x148   : > { %338 = vmatpush.msrb.mxu2 %v315_v42 }
 0x14a   : > { %339 = vmatpush.msrb.mxu2 %v314_v44 }
 0x14c   : > { %340 = vmatpush.msrb.mxu2 %v313_v45 }
 0x14d   : > { %424 = vmatmul.msk.f32.vlgmr.msrb.gmra.mxu2 %vm275_vm2, %v322_v46 }
 0x1d0   : > { %v342_v49 = vpop.f32.mrf.mxu2 }
 0x1d1   : > { %v343_v50 = vadd.f32 %v342_v49, %v319_v47 }
 0x1d3   : > { %v345_v51 = vsub.f32 %v343_v50, %v180_v48 }
 0x1d5   : > { %v346_v52 = vmul.f32 %v345_v51, %v345_v51 }
 0x1d7   : > { %v347_v53 = vrot.slane %v346_v52, 4 }
 0x1d9   : > { %v348_v54 = vadd.f32 %v347_v53, %v346_v52 }
 0x1db   : > { %v349_v55 = vrot.slane %v348_v54, 2 }
 0x1dd   : > { %v350_v56 = vadd.f32 %v349_v55, %v348_v54 }
 0x1df   : > { %v351_v57 = vrot.slane %v350_v56, 1 }
 0x1e1   : > { %v352_v58 = vadd.f32 %v351_v57, %v350_v56 }
 0x1e3   : > { %353 = vst [vmem:[%s178_s15] sm:$0x1] %v352_v58 }
 0x1e4 PF: > { %p9_p9 = scmp.ge.s32.totalorder %s529_s13, 4   ;;  %s607_s9 = smov %s486_s10 }
 0x1e5   : > { %s608_s10 = smov %s538_s16  ;;  %s609_s11 = smov %s529_s13 }
 0x1e6   :  { %11 = sbr.rel (!%p9_p9) target bundleno = 2 (0x2), region = 101 }

</bundles_post_ra>
